<compile_context>
chip_gen: v7x
topology: tpu7x:2x2x1
jax: 0.10.0
libtpu: 0.0.40
codegen_flags: <defaults>
</compile_context>

<pallas_src>
import functools

import jax
import jax.numpy as jnp
from jax.experimental import pallas as pl
from jax.experimental.pallas import tpu as pltpu

_LANE = 128      # last-dim tile (vreg lanes)
_SUBLANE = 8     # second-to-last-dim tile (vreg sublanes, f32)

_VMEM_CAP_BYTES = 64 << 20          # conservative cap (v7x physical VMEM)
_WEIGHT_RESIDENT_BYTES = 40 << 20   # above this, stream weights layer-by-layer


def _round_up(n, m):
    return ((n + m - 1) // m) * m


# --------------------------------------------------------------------------- #
# Kernel body: the whole (sub-)network fused — matmul + bias + ReLU per layer. #
# --------------------------------------------------------------------------- #
def _fused_mlp_kernel(*refs, n_layers, compute_dtype):
    # refs = (x_ref, w0, b0, w1, b1, ..., w{L-1}, b{L-1}, o_ref)
    x_ref = refs[0]
    o_ref = refs[-1]
    y = x_ref[...]
    for l in range(n_layers):
        w_ref = refs[1 + 2 * l]
        b_ref = refs[2 + 2 * l]
        # MXU matmul (optionally bf16 inputs), f32 accumulate, f32 bias+ReLU.
        y = jnp.dot(
            y.astype(compute_dtype),
            w_ref[...].astype(compute_dtype),
            preferred_element_type=jnp.float32,
        )
        y = jnp.maximum(y + b_ref[...], 0.0)  # ReLU after every layer (incl. last)
    o_ref[...] = y.astype(o_ref.dtype)


# --------------------------------------------------------------------------- #
# One pallas_call over a batch-tiled grid with all given layers VMEM-resident. #
# --------------------------------------------------------------------------- #
def _mlp_call(xp, layers, TM, pB, pdims, compute_dtype, out_dtype):
    n_layers = len(layers)
    vmem = pltpu.MemorySpace.VMEM
    single = pl.Buffered(1)  # constant index_map -> no point double-buffering

    in_specs = [pl.BlockSpec((TM, pdims[0]), lambda i: (i, 0), memory_space=vmem)]
    flat_params = []
    for wp, bp in layers:
        in_specs.append(
            pl.BlockSpec(wp.shape, lambda i: (0, 0), memory_space=vmem,
                         pipeline_mode=single))
        in_specs.append(
            pl.BlockSpec(bp.shape, lambda i: (0, 0), memory_space=vmem,
                         pipeline_mode=single))
        flat_params += [wp, bp]
    out_spec = pl.BlockSpec((TM, pdims[-1]), lambda i: (i, 0), memory_space=vmem)

    # Explicit VMEM budget (default scoped limit is 16/32 MiB, well below what
    # a wide layer needs even though it would fit physical VMEM).
    weight_bytes = sum(w.size * w.dtype.itemsize + b.size * b.dtype.itemsize
                       for w, b in layers)
    io_bytes = 2 * TM * (pdims[0] + pdims[-1]) * 4       # double-buffered x / out tiles
    act_bytes = 2 * TM * max(pdims) * 4                   # live f32 intermediates
    vmem_limit = int(min(max(weight_bytes + io_bytes + act_bytes + (4 << 20),
                             32 << 20),
                         _VMEM_CAP_BYTES))

    flops = sum(2 * pB * w.shape[0] * w.shape[1] for w, _ in layers)
    bytes_accessed = (xp.size * xp.dtype.itemsize
                      + weight_bytes
                      + pB * pdims[-1] * 4)

    return pl.pallas_call(
        functools.partial(_fused_mlp_kernel, n_layers=n_layers,
                          compute_dtype=compute_dtype),
        out_shape=jax.ShapeDtypeStruct((pB, pdims[-1]), out_dtype),
        grid=(pB // TM,),
        in_specs=in_specs,
        out_specs=out_spec,
        compiler_params=pltpu.CompilerParams(
            dimension_semantics=("parallel",),
            vmem_limit_bytes=vmem_limit,
        ),
        cost_estimate=pl.CostEstimate(
            flops=flops, transcendentals=0, bytes_accessed=bytes_accessed),
    )(xp, *flat_params)


# --------------------------------------------------------------------------- #
# Wrapper-side tiling / padding logic.                                         #
# --------------------------------------------------------------------------- #
def _choose_tiling(B, pdims, tm):
    """Pick (TM, pB) so that pB - B < TM (bounded waste) and the grid gets
    >= 2 steps for non-tiny batches (lets 'parallel' span both v7x cores;
    one extra ~0.35us grid step is negligible on single-core v5e/v6e)."""
    tm_cap = min(tm, 128) if max(pdims) >= 256 else tm     # vreg pressure guard
    tm_cap = max(_SUBLANE, _round_up(tm_cap, _SUBLANE))
    pB8 = _round_up(B, _SUBLANE)
    n_steps = max(-(-pB8 // tm_cap), 2 if pB8 >= 128 else 1)
    TM = _round_up(-(-pB8 // n_steps), _SUBLANE)
    pB = n_steps * TM
    return TM, pB


def prepare_params(params, compute_dtype=None):
    """Pad parameters to lane-aligned shapes ONCE (hoisted out of the per-call
    hot path). params: list of (w (in, out) f32, b (out,)/(1,out) f32).
    compute_dtype=None -> auto: bf16 when the widest padded layer >= 512
    (MXU-bound regime), else exact f32. Biases always stay f32."""
    dims = [params[0][0].shape[0]] + [w.shape[1] for w, _ in params]
    pdims = [_round_up(d, _LANE) for d in dims]
    if compute_dtype is None:
        compute_dtype = jnp.bfloat16 if max(pdims) >= 512 else jnp.float32

    layers = []
    for l, (w, b) in enumerate(params):
        wp = jnp.zeros((pdims[l], pdims[l + 1]), compute_dtype)
        wp = wp.at[: w.shape[0], : w.shape[1]].set(w.astype(compute_dtype))
        bp = jnp.zeros((1, pdims[l + 1]), jnp.float32)
        bp = bp.at[:, : b.shape[-1]].set(b.reshape(1, -1).astype(jnp.float32))
        layers.append((wp, bp))

    return dict(layers=layers, pdims=pdims, in_dim=dims[0], out_dim=dims[-1],
                compute_dtype=compute_dtype)


def nutrition_mlp_forward(x, prepared, *, tm=256):
    """Forward pass of Nutrition_MLP: x -> relu(linear(x)) for every layer."""
    layers = prepared["layers"]
    pdims = prepared["pdims"]
    in_dim = prepared["in_dim"]
    out_dim = prepared["out_dim"]
    compute_dtype = prepared["compute_dtype"]

    B = x.shape[0]
    TM, pB = _choose_tiling(B, pdims, tm)

    # Only x is padded per call (exact: padded rows/cols are zero and sliced off).
    xp = jnp.zeros((pB, pdims[0]), jnp.float32).at[:B, :in_dim].set(
        x.astype(jnp.float32))

    weight_bytes = sum(w.size * w.dtype.itemsize + b.size * b.dtype.itemsize
                       for w, b in layers)
    if weight_bytes <= _WEIGHT_RESIDENT_BYTES:
        # Fast path: the whole network fused into one pallas_call, all weights
        # VMEM-resident, intermediate activations never touch HBM.
        out_p = _mlp_call(xp, layers, TM, pB, pdims, compute_dtype, jnp.float32)
    else:
        # v7x-safe fallback: weight set too large to keep resident (64 MiB VMEM)
        # -> stream one layer per pallas_call; activations round-trip HBM.
        # TODO(synk): K/N-tile individual layers (pltpu.emit_pipeline) if a
        # single padded W ever exceeds the resident budget on its own.
        y = xp
        for l, (wp, bp) in enumerate(layers):
            y = _mlp_call(y, [(wp, bp)], TM, pB, pdims[l:l + 2],
                          compute_dtype, jnp.float32)
        out_p = y

    return out_p[:B, :out_dim]


# --------------------------------------------------------------------------- #
# Param init mirroring PyTorch nn.Linear defaults (weights stored (in, out)).  #
# --------------------------------------------------------------------------- #
def init_params(key, hidden_layers, in_dim=100, out_dim=4):
    dims = [in_dim] + list(hidden_layers) + [out_dim]
    params = []
    for i in range(len(dims) - 1):
        fan_in, fan_out = dims[i], dims[i + 1]
        key, kw, kb = jax.random.split(key, 3)
        bound = 1.0 / jnp.sqrt(jnp.float32(fan_in))
        w = jax.random.uniform(kw, (fan_in, fan_out), jnp.float32, -bound, bound)
        b = jax.random.uniform(kb, (1, fan_out), jnp.float32, -bound, bound)
        params.append((w, b))
    return params


if __name__ == "__main__":
    key = jax.random.PRNGKey(0)
    key, kx = jax.random.split(key)

    hidden_layers = [32, 16]          # small synthetic config
    batch = 8
    x = jax.random.normal(kx, (batch, 100), jnp.float32)

    params = init_params(key, hidden_layers)
    prepared = prepare_params(params)     # pad once, outside the hot path

    out = nutrition_mlp_forward(x, prepared)
    out = jax.block_until_ready(out)

    # Reference check in plain JAX (same math as the PyTorch module:
    # ReLU after every Linear, including the final one).
    ref = x
    for w, b in params:
        ref = jnp.maximum(ref @ w + b, 0.0)

    assert out.shape == (batch, 4)
    assert jnp.allclose(out, ref, atol=1e-5, rtol=1e-5)

    print("KERNEL_OK")
</pallas_src>

<mosaic_0001>
module attributes {stable_mosaic.version = 11 : i64} {
  func.func @_fused_mlp_kernel(%arg0: i32, %arg1: memref<8x128xf32, #tpu.memory_space<vmem>>, %arg2: memref<128x128xf32, #tpu.memory_space<vmem>>, %arg3: memref<1x128xf32, #tpu.memory_space<vmem>>, %arg4: memref<128x128xf32, #tpu.memory_space<vmem>>, %arg5: memref<1x128xf32, #tpu.memory_space<vmem>>, %arg6: memref<128x128xf32, #tpu.memory_space<vmem>>, %arg7: memref<1x128xf32, #tpu.memory_space<vmem>>, %arg8: memref<8x128xf32, #tpu.memory_space<vmem>>) attributes {dimension_semantics = [#tpu.dimension_semantics<parallel>], iteration_bounds = array<i64: 1>, scalar_prefetch = 0 : i64, scratch_operands = 0 : i64, tpu.core_type = #tpu.core_type<tc>, window_params = [{transform_indices = @transform_0, window_bounds = array<i64: 8, 128>}, {pipeline_mode = #tpu.pipeline_mode<synchronous>, transform_indices = @transform_1, window_bounds = array<i64: 128, 128>}, {pipeline_mode = #tpu.pipeline_mode<synchronous>, transform_indices = @transform_2, window_bounds = array<i64: 1, 128>}, {pipeline_mode = #tpu.pipeline_mode<synchronous>, transform_indices = @transform_3, window_bounds = array<i64: 128, 128>}, {pipeline_mode = #tpu.pipeline_mode<synchronous>, transform_indices = @transform_4, window_bounds = array<i64: 1, 128>}, {pipeline_mode = #tpu.pipeline_mode<synchronous>, transform_indices = @transform_5, window_bounds = array<i64: 128, 128>}, {pipeline_mode = #tpu.pipeline_mode<synchronous>, transform_indices = @transform_6, window_bounds = array<i64: 1, 128>}, {transform_indices = @transform_7, window_bounds = array<i64: 8, 128>}]} {
    %c0 = arith.constant 0 : index
    %c0_0 = arith.constant 0 : index
    %0 = vector.load %arg1[%c0, %c0_0] : memref<8x128xf32, #tpu.memory_space<vmem>>, vector<8x128xf32>
    %c0_1 = arith.constant 0 : index
    %c0_2 = arith.constant 0 : index
    %1 = vector.load %arg2[%c0_1, %c0_2] : memref<128x128xf32, #tpu.memory_space<vmem>>, vector<128x128xf32>
    %cst = arith.constant dense<0.000000e+00> : vector<8x128xf32>
    %2 = tpu.matmul %0, %1, %cst {dimension_numbers = #tpu.dot_dimension_numbers<[1], [0], [0], [1], [0, 0, 1, 1], [], []>} : vector<8x128xf32>, vector<128x128xf32>, vector<8x128xf32> -> vector<8x128xf32>
    %c0_3 = arith.constant 0 : index
    %c0_4 = arith.constant 0 : index
    %3 = vector.load %arg3[%c0_3, %c0_4] : memref<1x128xf32, #tpu.memory_space<vmem>>, vector<1x128xf32>
    %4 = vector.broadcast %3 : vector<1x128xf32> to vector<8x128xf32>
    %5 = arith.addf %2, %4 : vector<8x128xf32>
    %cst_5 = arith.constant 0.000000e+00 : f32
    %6 = vector.broadcast %cst_5 : f32 to vector<8x128xf32>
    %7 = arith.maximumf %5, %6 : vector<8x128xf32>
    %c0_6 = arith.constant 0 : index
    %c0_7 = arith.constant 0 : index
    %8 = vector.load %arg4[%c0_6, %c0_7] : memref<128x128xf32, #tpu.memory_space<vmem>>, vector<128x128xf32>
    %cst_8 = arith.constant dense<0.000000e+00> : vector<8x128xf32>
    %9 = tpu.matmul %7, %8, %cst_8 {dimension_numbers = #tpu.dot_dimension_numbers<[1], [0], [0], [1], [0, 0, 1, 1], [], []>} : vector<8x128xf32>, vector<128x128xf32>, vector<8x128xf32> -> vector<8x128xf32>
    %c0_9 = arith.constant 0 : index
    %c0_10 = arith.constant 0 : index
    %10 = vector.load %arg5[%c0_9, %c0_10] : memref<1x128xf32, #tpu.memory_space<vmem>>, vector<1x128xf32>
    %11 = vector.broadcast %10 : vector<1x128xf32> to vector<8x128xf32>
    %12 = arith.addf %9, %11 : vector<8x128xf32>
    %cst_11 = arith.constant 0.000000e+00 : f32
    %13 = vector.broadcast %cst_11 : f32 to vector<8x128xf32>
    %14 = arith.maximumf %12, %13 : vector<8x128xf32>
    %c0_12 = arith.constant 0 : index
    %c0_13 = arith.constant 0 : index
    %15 = vector.load %arg6[%c0_12, %c0_13] : memref<128x128xf32, #tpu.memory_space<vmem>>, vector<128x128xf32>
    %cst_14 = arith.constant dense<0.000000e+00> : vector<8x128xf32>
    %16 = tpu.matmul %14, %15, %cst_14 {dimension_numbers = #tpu.dot_dimension_numbers<[1], [0], [0], [1], [0, 0, 1, 1], [], []>} : vector<8x128xf32>, vector<128x128xf32>, vector<8x128xf32> -> vector<8x128xf32>
    %c0_15 = arith.constant 0 : index
    %c0_16 = arith.constant 0 : index
    %17 = vector.load %arg7[%c0_15, %c0_16] : memref<1x128xf32, #tpu.memory_space<vmem>>, vector<1x128xf32>
    %18 = vector.broadcast %17 : vector<1x128xf32> to vector<8x128xf32>
    %19 = arith.addf %16, %18 : vector<8x128xf32>
    %cst_17 = arith.constant 0.000000e+00 : f32
    %20 = vector.broadcast %cst_17 : f32 to vector<8x128xf32>
    %21 = arith.maximumf %19, %20 : vector<8x128xf32>
    %c0_18 = arith.constant 0 : index
    %c0_19 = arith.constant 0 : index
    %22 = vector.load %arg8[%c0_18, %c0_19] : memref<8x128xf32, #tpu.memory_space<vmem>>, vector<8x128xf32>
    tpu.vector_store %arg8[%c0_18, %c0_19], %21 {strides = array<i32>} : memref<8x128xf32, #tpu.memory_space<vmem>>, vector<8x128xf32>,
    return
  }
  func.func @transform_0(%arg0: i32) -> (i32, i32) {
    %c0_i32 = arith.constant 0 : i32
    %c0_i32_0 = arith.constant 0 : i32
    return %arg0, %c0_i32 : i32, i32
  }
  func.func @transform_1(%arg0: i32) -> (i32, i32) {
    %c0_i32 = arith.constant 0 : i32
    %c0_i32_0 = arith.constant 0 : i32
    %c0_i32_1 = arith.constant 0 : i32
    return %c0_i32, %c0_i32_0 : i32, i32
  }
  func.func @transform_2(%arg0: i32) -> (i32, i32) {
    %c0_i32 = arith.constant 0 : i32
    %c0_i32_0 = arith.constant 0 : i32
    %c0_i32_1 = arith.constant 0 : i32
    return %c0_i32, %c0_i32_0 : i32, i32
  }
  func.func @transform_3(%arg0: i32) -> (i32, i32) {
    %c0_i32 = arith.constant 0 : i32
    %c0_i32_0 = arith.constant 0 : i32
    %c0_i32_1 = arith.constant 0 : i32
    return %c0_i32, %c0_i32_0 : i32, i32
  }
  func.func @transform_4(%arg0: i32) -> (i32, i32) {
    %c0_i32 = arith.constant 0 : i32
    %c0_i32_0 = arith.constant 0 : i32
    %c0_i32_1 = arith.constant 0 : i32
    return %c0_i32, %c0_i32_0 : i32, i32
  }
  func.func @transform_5(%arg0: i32) -> (i32, i32) {
    %c0_i32 = arith.constant 0 : i32
    %c0_i32_0 = arith.constant 0 : i32
    %c0_i32_1 = arith.constant 0 : i32
    return %c0_i32, %c0_i32_0 : i32, i32
  }
  func.func @transform_6(%arg0: i32) -> (i32, i32) {
    %c0_i32 = arith.constant 0 : i32
    %c0_i32_0 = arith.constant 0 : i32
    %c0_i32_1 = arith.constant 0 : i32
    return %c0_i32, %c0_i32_0 : i32, i32
  }
  func.func @transform_7(%arg0: i32) -> (i32, i32) {
    %c0_i32 = arith.constant 0 : i32
    %c0_i32_0 = arith.constant 0 : i32
    return %arg0, %c0_i32 : i32, i32
  }
}

</mosaic_0001>

<bundles_post_ra>
// kernel: tpu_custom_call.1
= control target key start
LH: loop header
LB: loop body
LE: loop exit
PB: predicated region body
PF: predicated region fallthrough
CT: control target
= control target key end

     0   :  { %12 = vsyncpa [#allocation3], 0  ;;  %s898_s0 = inlined_call_operand.hbm [shape: f32[8,128], index: 0, kind: input, shape index: {}]   ;;  %s899_s1 = inlined_call_operand.hbm [shape: f32[128,128], index: 1, kind: input, shape index: {}]   ;;  %s900_s2 = inlined_call_operand.vmem [shape: f32[1,128], index: 2, kind: input, shape index: {}]   ;;  %s901_s3 = inlined_call_operand.hbm [shape: f32[128,128], index: 3, kind: input, shape index: {}]   ;;  %s902_s4 = inlined_call_operand.vmem [shape: f32[1,128], index: 4, kind: input, shape index: {}]   ;;  %s903_s5 = inlined_call_operand.hbm [shape: f32[128,128], index: 5, kind: input, shape index: {}]   ;;  %s904_s6 = inlined_call_operand.vmem [shape: f32[1,128], index: 6, kind: input, shape index: {}]   ;;  %s905_s7 = inlined_call_operand.hbm [shape: f32[8,128], index: 7, kind: output, shape index: {}]  }
   0x1   :  { %13 = vsyncpa [#allocation6], 0 }
   0x2   :  { %14 = vsyncpa [#allocation9], 0 }
   0x3   :  { %15 = vsyncpa [#allocation4], 0  ;;  %s740_s24 = smov [#allocation5]   ;;  %s622_s28 = scalar_lea.hbm %s899_s1, 2048 }
   0x4   :  { %s31_s25 = sshll.u32 %s740_s24, 4  ;;  %p623_p0 = scmp.ne.s32.totalorder %s899_s1, %s622_s28  ;;  %s32_s25 = int_to_ptr.vmem [resolvable:$true] %s31_s25 }
   0x5   :  { %p626_p1 = scmp.lt.u32.totalorder %s622_s28, %s899_s1 }
   0x7   :  { %p628_p2 = pnand %p626_p1, %p623_p0 }
   0x9   :  { %631 = shalt.err (!%p628_p2)
}
   0xa   :  { %s632_s10 = scalar_lea.vmem %s32_s25, 2048  ;;  %p637_p4 = scmp.lt.s32.totalorder %s32_s25, %s32_s25 }
   0xb   :  { %p633_p3 = scmp.ne.s32.totalorder %s32_s25, %s632_s10  ;;  %p638_p5 = scmp.lt.s32.totalorder %s632_s10, %s632_s10 }
   0xd   :  { %p639_p6 = por %p638_p5, %p637_p4 }
   0xf   :  { %p640_p7 = pnand %p639_p6, %p633_p3 }
  0x11   :  { %643 = shalt.err (!%p640_p7)
}
  0x12   :  { %s741_s11 = smov 128   ;;  %s742_s12 = smov 8  }
  0x13   :  { %37 = dma.hbm_to_vmem [thread:$0]  %s899_s1, 2048, %s32_s25, [#allocation6], %s741_s11, %s741_s11, %s742_s12  }
  0x14   :  { %s743_s15 = smov [#allocation2]   ;;  %s744_s17 = smov [#allocation7]  }
  0x15   :  { %s22_s16 = sshll.u32 %s743_s15, 4  ;;  %s45_s18 = sshll.u32 %s744_s17, 4  ;;  %s23_s16 = int_to_ptr.vmem [resolvable:$true] %s22_s16  ;;  %s46_s18 = int_to_ptr.vmem [resolvable:$true] %s45_s18 }
  0x16   :  { %s644_s21 = scalar_lea.hbm %s898_s0, 128 }
  0x17   :  { %p645_p8 = scmp.ne.s32.totalorder %s898_s0, %s644_s21  ;;  %p648_p9 = scmp.lt.u32.totalorder %s644_s21, %s898_s0 }
  0x19   :  { %p650_p10 = pnand %p648_p9, %p645_p8 }
  0x1b   :  { %653 = shalt.err (!%p650_p10)
}
  0x1c   :  { %s654_s1 = scalar_lea.vmem %s23_s16, 128  ;;  %p659_p12 = scmp.lt.s32.totalorder %s23_s16, %s23_s16 }
  0x1d   :  { %p655_p11 = scmp.ne.s32.totalorder %s23_s16, %s654_s1  ;;  %p660_p13 = scmp.lt.s32.totalorder %s654_s1, %s654_s1 }
  0x1f   :  { %p661_p0 = por %p660_p13, %p659_p12 }
  0x21   :  { %p662_p1 = pnand %p661_p0, %p655_p11 }
  0x23   :  { %665 = shalt.err (!%p662_p1)
}
  0x24   :  { %25 = dma.hbm_to_vmem [thread:$0]  %s898_s0, 128, %s23_s16, [#allocation3]  }
  0x25   :  { %s666_s30 = scalar_lea.hbm %s901_s3, 2048 }
  0x26   :  { %p667_p2 = scmp.ne.s32.totalorder %s901_s3, %s666_s30  ;;  %p670_p3 = scmp.lt.u32.totalorder %s666_s30, %s901_s3 }
  0x28   :  { %p672_p4 = pnand %p670_p3, %p667_p2 }
  0x2a   :  { %675 = shalt.err (!%p672_p4)
}
  0x2b   :  { %s676_s14 = scalar_lea.vmem %s46_s18, 2048  ;;  %p681_p6 = scmp.lt.s32.totalorder %s46_s18, %s46_s18 }
  0x2c   :  { %p677_p5 = scmp.ne.s32.totalorder %s46_s18, %s676_s14  ;;  %p682_p7 = scmp.lt.s32.totalorder %s676_s14, %s676_s14 }
  0x2e   :  { %p683_p8 = por %p682_p7, %p681_p6 }
  0x30   :  { %p684_p9 = pnand %p683_p8, %p677_p5 }
  0x32   :  { %687 = shalt.err (!%p684_p9)
}
  0x33   :  { %51 = dma.hbm_to_vmem [thread:$0]  %s901_s3, 2048, %s46_s18, [#allocation6], %s741_s11, %s741_s11, %s742_s12  }
  0x34   :  { %s745_s16 = smov [#allocation8]   ;;  %s688_s21 = scalar_lea.hbm %s903_s5, 2048 }
  0x35   :  { %s59_s17 = sshll.u32 %s745_s16, 4  ;;  %p689_p10 = scmp.ne.s32.totalorder %s903_s5, %s688_s21  ;;  %s60_s17 = int_to_ptr.vmem [resolvable:$true] %s59_s17 }
  0x36   :  { %p692_p11 = scmp.lt.u32.totalorder %s688_s21, %s903_s5 }
  0x38   :  { %p694_p12 = pnand %p692_p11, %p689_p10 }
  0x3a   :  { %697 = shalt.err (!%p694_p12)
}
  0x3b   :  { %s698_s1 = scalar_lea.vmem %s60_s17, 2048  ;;  %p703_p0 = scmp.lt.s32.totalorder %s60_s17, %s60_s17 }
  0x3c   :  { %p699_p13 = scmp.ne.s32.totalorder %s60_s17, %s698_s1  ;;  %p704_p1 = scmp.lt.s32.totalorder %s698_s1, %s698_s1 }
  0x3e   :  { %p705_p2 = por %p704_p1, %p703_p0 }
  0x40   :  { %p706_p3 = pnand %p705_p2, %p699_p13 }
  0x42   :  { %709 = shalt.err (!%p706_p3)
}
  0x43   :  { %65 = dma.hbm_to_vmem [thread:$0]  %s903_s5, 2048, %s60_s17, [#allocation9], %s741_s11, %s741_s11, %s742_s12  }
  0x44   :  { %732 = dma.done.wait [#allocation3], 128  }
  0x45   :  { %733 = vsyncadd [#allocation3], 4294967168 }
  0x46   :  { %734 = dma.done.wait [#allocation6], 4096  }
  0x47   :  { %735 = vsyncadd [#allocation6], 4294963200 }
  0x48   :  { %736 = dma.done.wait [#allocation9], 2048  }
  0x49   :  { %737 = vsyncadd [#allocation9], 4294965248  ;;  %v746_v0 = vmov 0.0|0.0   ;;  %vm747_vm0 = vmmov 0   ;;  %v748_v1 = vmov 0.0   ;;  %v81_v2 = vld [vmem:[#allocation5] sm:$0xff] }
  0x4a   :  { %540 = vmatprep.subr.bf16.mxu0 %v746_v0  ;;  %467 = vmatprep.mubr.msk.f32.mxu0 %vm747_vm0, %v748_v1  ;;  %v82_v3 = vld [vmem:[#allocation5 + $0x8] sm:$0xff]  ;;  %v83_v4 = vld [vmem:[#allocation5 + $0x10] sm:$0xff]  ;;  %v84_v6 = vld [vmem:[#allocation5 + $0x18] sm:$0xff]  ;;  %s749_s28 = smov [#allocation10]  }
  0x4b   :  { %564 = vmatprep.subr.bf16.mxu1 %v746_v0  ;;  %502 = vmatprep.mubr.msk.f32.mxu1 %vm747_vm0, %v748_v1  ;;  %v541_v5 = vpack.c.bf16 %v82_v3, %v81_v2  ;;  %v544_v7 = vpack.c.bf16 %v84_v6, %v83_v4  ;;  %v85_v8 = vld [vmem:[#allocation5 + $0x20] sm:$0xff]  ;;  %v86_v9 = vld [vmem:[#allocation5 + $0x28] sm:$0xff]  ;;  %v177_v12 = vld [vmem:[#allocation7 + $0x10] sm:$0xff]  ;;  %s370_s29 = sshll.u32 %s749_s28, 4  ;;  %s371_s29 = int_to_ptr.vmem [resolvable:$true] %s370_s29 }
  0x4c   :  { %v175_v10 = vld [vmem:[#allocation7] sm:$0xff]  ;;  %v176_v11 = vld [vmem:[#allocation7 + $0x8] sm:$0xff]  ;;  %v178_v13 = vld [vmem:[#allocation7 + $0x18] sm:$0xff]  ;;  %v547_v14 = vpack.c.bf16 %v86_v9, %v85_v8  ;;  %s710_s30 = scalar_lea.vmem %s371_s29, 128  ;;  %p715_p5 = scmp.lt.s32.totalorder %s371_s29, %s371_s29 }
  0x4d   :  { %542 = vmatpush3.bf16.msra.mxu0 %v541_v5  ;;  %v565_v15 = vpack.c.bf16 %v176_v11, %v175_v10  ;;  %v87_v16 = vld [vmem:[#allocation5 + $0x30] sm:$0xff]  ;;  %v88_v17 = vld [vmem:[#allocation5 + $0x38] sm:$0xff]  ;;  %v568_v18 = vpack.c.bf16 %v178_v13, %v177_v12  ;;  %v179_v19 = vld [vmem:[#allocation7 + $0x20] sm:$0xff]  ;;  %p711_p4 = scmp.ne.s32.totalorder %s371_s29, %s710_s30  ;;  %p716_p6 = scmp.lt.s32.totalorder %s710_s30, %s710_s30 }
  0x4e   :  { %543 = vmatprep.subr.bf16.mxu0 %v746_v0  ;;  %v180_v20 = vld [vmem:[#allocation7 + $0x28] sm:$0xff]  ;;  %v550_v21 = vpack.c.bf16 %v88_v17, %v87_v16  ;;  %v89_v22 = vld [vmem:[#allocation5 + $0x40] sm:$0xff]  ;;  %v181_v25 = vld [vmem:[#allocation7 + $0x30] sm:$0xff] }
  0x4f   :  { %566 = vmatpush3.bf16.msra.mxu1 %v565_v15  ;;  %v90_v23 = vld [vmem:[#allocation5 + $0x48] sm:$0xff]  ;;  %v571_v24 = vpack.c.bf16 %v180_v20, %v179_v19  ;;  %v182_v26 = vld [vmem:[#allocation7 + $0x38] sm:$0xff]  ;;  %v91_v28 = vld [vmem:[#allocation5 + $0x50] sm:$0xff]  ;;  %p717_p7 = por %p716_p6, %p715_p5 }
  0x50   :  { %567 = vmatprep.subr.bf16.mxu1 %v746_v0  ;;  %v553_v27 = vpack.c.bf16 %v90_v23, %v89_v22  ;;  %v92_v29 = vld [vmem:[#allocation5 + $0x58] sm:$0xff]  ;;  %v574_v30 = vpack.c.bf16 %v182_v26, %v181_v25  ;;  %v183_v31 = vld [vmem:[#allocation7 + $0x40] sm:$0xff]  ;;  %v184_v32 = vld [vmem:[#allocation7 + $0x48] sm:$0xff] }
  0x51   :  { %545 = vmatpush3.bf16.msra.mxu0 %v544_v7  ;;  %v556_v33 = vpack.c.bf16 %v92_v29, %v91_v28  ;;  %v93_v34 = vld [vmem:[#allocation5 + $0x60] sm:$0xff]  ;;  %v94_v35 = vld [vmem:[#allocation5 + $0x68] sm:$0xff]  ;;  %v577_v36 = vpack.c.bf16 %v184_v32, %v183_v31  ;;  %v185_v37 = vld [vmem:[#allocation7 + $0x50] sm:$0xff]  ;;  %p718_p8 = pnand %p717_p7, %p711_p4 }
  0x52   :  { %546 = vmatprep.subr.bf16.mxu0 %v746_v0  ;;  %v186_v38 = vld [vmem:[#allocation7 + $0x58] sm:$0xff]  ;;  %v559_v39 = vpack.c.bf16 %v94_v35, %v93_v34  ;;  %v95_v40 = vld [vmem:[#allocation5 + $0x70] sm:$0xff]  ;;  %v187_v43 = vld [vmem:[#allocation7 + $0x60] sm:$0xff] }
  0x53   :  { %569 = vmatpush3.bf16.msra.mxu1 %v568_v18  ;;  %v96_v41 = vld [vmem:[#allocation5 + $0x78] sm:$0xff]  ;;  %v580_v42 = vpack.c.bf16 %v186_v38, %v185_v37  ;;  %v188_v44 = vld [vmem:[#allocation7 + $0x68] sm:$0xff]  ;;  %v189_v48 = vld [vmem:[#allocation7 + $0x70] sm:$0xff] }
  0x54   :  { %570 = vmatprep.subr.bf16.mxu1 %v746_v0  ;;  %v562_v45 = vpack.c.bf16 %v96_v41, %v95_v40  ;;  %v583_v46 = vpack.c.bf16 %v188_v44, %v187_v43  ;;  %v80_v47 = vld [vmem:[#allocation2] sm:$0xff]  ;;  %v269_v51 = vld [vmem:[#allocation8] sm:$0xff]  ;;  %v270_v52 = vld [vmem:[#allocation8 + $0x8] sm:$0xff] }
  0x55   :  { %548 = vmatpush3.bf16.msra.mxu0 %v547_v14  ;;  %v190_v49 = vld [vmem:[#allocation7 + $0x78] sm:$0xff]  ;;  %v271_v53 = vld [vmem:[#allocation8 + $0x10] sm:$0xff]  ;;  %v589_v54 = vpack.c.bf16 %v270_v52, %v269_v51  ;;  %v273_v57 = vld [vmem:[#allocation8 + $0x20] sm:$0xff] }
  0x56   :  { %549 = vmatprep.subr.bf16.mxu0 %v746_v0  ;;  %v586_v50 = vpack.c.bf16 %v190_v49, %v189_v48  ;;  %v272_v55 = vld [vmem:[#allocation8 + $0x18] sm:$0xff]  ;;  %v274_v58 = vld [vmem:[#allocation8 + $0x28] sm:$0xff]  ;;  %v275_v60 = vld [vmem:[#allocation8 + $0x30] sm:$0xff] }
  0x57   :  { %572 = vmatpush3.bf16.msra.mxu1 %v571_v24  ;;  %v592_v56 = vpack.c.bf16 %v272_v55, %v271_v53  ;;  %v595_v59 = vpack.c.bf16 %v274_v58, %v273_v57  ;;  %v276_v61 = vld [vmem:[#allocation8 + $0x38] sm:$0xff]  ;;  %v277_v63 = vld [vmem:[#allocation8 + $0x40] sm:$0xff]  ;;  %v279_v3 = vld [vmem:[#allocation8 + $0x50] sm:$0xff] }
  0x58   :  { %573 = vmatprep.subr.bf16.mxu1 %v746_v0  ;;  %v598_v62 = vpack.c.bf16 %v276_v61, %v275_v60  ;;  %v280_v4 = vld [vmem:[#allocation8 + $0x58] sm:$0xff]  ;;  %v281_v6 = vld [vmem:[#allocation8 + $0x60] sm:$0xff]  ;;  %v282_v7 = vld [vmem:[#allocation8 + $0x68] sm:$0xff] }
  0x59   :  { %551 = vmatpush3.bf16.msra.mxu0 %v550_v21  ;;  %v604_v5 = vpack.c.bf16 %v280_v4, %v279_v3  ;;  %v607_v8 = vpack.c.bf16 %v282_v7, %v281_v6  ;;  %v381_v9 = vld [vmem:[%s900_s2] ss:$0 sm:$0xff]  ;;  %v283_v14 = vld [vmem:[#allocation8 + $0x70] sm:$0xff] }
  0x5a   :  { %552 = vmatprep.subr.bf16.mxu0 %v746_v0  ;;  %v284_v15 = vld [vmem:[#allocation8 + $0x78] sm:$0xff] }
  0x5b   :  { %575 = vmatpush3.bf16.msra.mxu1 %v574_v30  ;;  %v610_v16 = vpack.c.bf16 %v284_v15, %v283_v14  ;;  %v382_v17 = vld [vmem:[%s902_s4] ss:$0 sm:$0xff] }
  0x5c   :  { %576 = vmatprep.subr.bf16.mxu1 %v746_v0  ;;  %v383_v21 = vld [vmem:[%s904_s6] ss:$0 sm:$0xff] }
  0x5d   :  { %554 = vmatpush3.bf16.msra.mxu0 %v553_v27 }
  0x5e   :  { %555 = vmatprep.subr.bf16.mxu0 %v746_v0 }
  0x5f   :  { %578 = vmatpush3.bf16.msra.mxu1 %v577_v36 }
  0x60   :  { %579 = vmatprep.subr.bf16.mxu1 %v746_v0 }
  0x61   :  { %557 = vmatpush3.bf16.msra.mxu0 %v556_v33 }
  0x62   :  { %558 = vmatprep.subr.bf16.mxu0 %v746_v0 }
  0x63   :  { %581 = vmatpush3.bf16.msra.mxu1 %v580_v42 }
  0x64   :  { %582 = vmatprep.subr.bf16.mxu1 %v746_v0 }
  0x65   :  { %560 = vmatpush3.bf16.msra.mxu0 %v559_v39 }
  0x66   :  { %561 = vmatprep.subr.bf16.mxu0 %v746_v0 }
  0x67   :  { %584 = vmatpush3.bf16.msra.mxu1 %v583_v46 }
  0x68   :  { %585 = vmatprep.subr.bf16.mxu1 %v746_v0 }
  0x69   :  { %563 = vmatpush3.bf16.msra.mxu0 %v562_v45 }
  0x6a   :  { %588 = vmatprep.subr.bf16.mxu0 %v746_v0 }
  0x6b   :  { %587 = vmatpush3.bf16.msra.mxu1 %v586_v50 }
  0x6c   :  { %468 = vmatmul.mubr.f32.vlgmr.msra.gmra.mrb[0].mxu0 %v80_v47 }
  0x6d   :  { %537 = vmatprep.mubr.msk.f32.mxu0 %vm747_vm0, %v748_v1  ;;  %590 = vmatpush3.bf16.msra.mxu0 %v589_v54  ;;  %v278_v1 = vld [vmem:[#allocation8 + $0x48] sm:$0xff] }
  0x6e   :  { %591 = vmatprep.subr.bf16.mxu0 %v746_v0  ;;  %v601_v2 = vpack.c.bf16 %v278_v1, %v277_v63 }
  0x71   :  { %593 = vmatpush3.bf16.msra.mxu0 %v592_v56 }
  0x72   :  { %594 = vmatprep.subr.bf16.mxu0 %v746_v0 }
  0x75   :  { %596 = vmatpush3.bf16.msra.mxu0 %v595_v59 }
  0x76   :  { %597 = vmatprep.subr.bf16.mxu0 %v746_v0 }
  0x79   :  { %599 = vmatpush3.bf16.msra.mxu0 %v598_v62 }
  0x7a   :  { %600 = vmatprep.subr.bf16.mxu0 %v746_v0 }
  0x7d   :  { %602 = vmatpush3.bf16.msra.mxu0 %v601_v2 }
  0x7e   :  { %603 = vmatprep.subr.bf16.mxu0 %v746_v0 }
  0x81   :  { %605 = vmatpush3.bf16.msra.mxu0 %v604_v5 }
  0x82   :  { %606 = vmatprep.subr.bf16.mxu0 %v746_v0 }
  0x85   :  { %608 = vmatpush3.bf16.msra.mxu0 %v607_v8 }
  0x86   :  { %609 = vmatprep.subr.bf16.mxu0 %v746_v0 }
  0x89   :  { %611 = vmatpush3.bf16.msra.mxu0 %v610_v16 }
 0x13f   :  { %v170_v10 = vpop.f32.mrb[0].mxu0 }
 0x140   :  { %v171_v11 = vadd.f32 %v381_v9, %v170_v10  ;;  %v469_v12 = vpop.f32.mrb[1].mxu0 }
 0x142   :  { %v174_v13 = vmax.f32 %v171_v11, 0.0 }
 0x144   :  { %503 = vmatmul.mubr.f32.vlgmr.msra.gmra.mrb[0].mxu1 %v174_v13 }
 0x217   :  { %v264_v18 = vpop.f32.mrb[0].mxu1 }
 0x218   :  { %v265_v19 = vadd.f32 %v382_v17, %v264_v18  ;;  %v504_v0 = vpop.f32.mrb[1].mxu1 }
 0x21a   :  { %v268_v20 = vmax.f32 %v265_v19, 0.0 }
 0x21c   :  { %538 = vmatmul.mubr.f32.vlgmr.msra.gmra.mrb[2].mxu0 %v268_v20 }
 0x2ef   :  { %v358_v22 = vpop.f32.mrb[2].mxu0 }
 0x2f0   :  { %v359_v23 = vadd.f32 %v383_v21, %v358_v22  ;;  %v539_v24 = vpop.f32.mrb[3].mxu0 }
 0x2f2   :  { %v362_v25 = vmax.f32 %v359_v23, 0.0 }
 0x2f4   :  { %363 = vst [vmem:[#allocation10] sm:$0xff] %v362_v25 }
 0x2f5   :  { %721 = shalt.err (!%p718_p8)
}
 0x2f6   :  { %s722_s9 = scalar_lea.hbm %s905_s7, 128 }
 0x2f7   :  { %p723_p9 = scmp.ne.s32.totalorder %s905_s7, %s722_s9  ;;  %p726_p10 = scmp.lt.u32.totalorder %s722_s9, %s905_s7 }
 0x2f9   :  { %p728_p11 = pnand %p726_p10, %p723_p9 }
 0x2fb   :  { %731 = shalt.err (!%p728_p11)
}
 0x2fc   :  { %373 = dma.vmem_to_hbm [thread:$0]  %s371_s29, 128, %s905_s7, [#allocation4]  }
 0x2fd   :  { %738 = dma.done.wait [#allocation4], 128  }
 0x2fe   :  { %739 = vsyncadd [#allocation4], 4294967168 }
 0x2ff   :  { %377 = vsyncpa [#allocation3], 1 }
 0x300   :  { %378 = vsyncpa [#allocation6], 1 }
 0x301   :  { %379 = vsyncpa [#allocation9], 1 }
 0x302   :  { %380 = vsyncpa [#allocation4], 1 }

</bundles_post_ra>
